<compile_context>
chip_gen: v7x
topology: tpu7x:2x2x1
jax: 0.10.0
libtpu: 0.0.40
codegen_flags: <defaults>
</compile_context>

<pallas_src>
import jax
import jax.numpy as jnp
from jax import lax
from jax.experimental import pallas as pl
from jax.experimental.pallas import tpu as pltpu


_CHUNK = 512  # lanes per inner step: keeps per-layer activations in ~a dozen vregs


def _round_up(n, m):
    return ((n + m - 1) // m) * m


def ikmlp_kernel(x_ref,
                 w1_ref, b1_ref,
                 w2_ref, b2_ref,
                 w3_ref, b3_ref,
                 w4_ref, b4_ref,
                 o_ref):
    # Lanes-as-batch layout: x_ref is (5, TB) f32, o_ref is (3, TB).
    tb = x_ref.shape[1]
    n_chunks = tb // _CHUNK  # static; tb is always a multiple of _CHUNK

    # Weights: small (~12 KB total), loaded once per grid step.
    w1 = w1_ref[...]
    w2 = w2_ref[...]
    w3 = w3_ref[...]
    w4 = w4_ref[...]
    # Hoisted bias broadcasts (JAX does not CSE broadcast_in_dim inside loops).
    b1 = jnp.broadcast_to(b1_ref[...], (b1_ref.shape[0], _CHUNK))
    b2 = jnp.broadcast_to(b2_ref[...], (b2_ref.shape[0], _CHUNK))
    b3 = jnp.broadcast_to(b3_ref[...], (b3_ref.shape[0], _CHUNK))
    b4 = jnp.broadcast_to(b4_ref[...], (b4_ref.shape[0], _CHUNK))

    def body(c, carry):
        start = c * _CHUNK
        if not isinstance(start, int):
            start = pl.multiple_of(start, _CHUNK)

        x = x_ref[:, pl.ds(start, _CHUNK)].astype(jnp.bfloat16)            # (5, C)

        h = jnp.dot(w1, x, preferred_element_type=jnp.float32) + b1
        h = jnp.maximum(h, 0.0).astype(jnp.bfloat16)                       # (64, C)

        h = jnp.dot(w2, h, preferred_element_type=jnp.float32) + b2
        h = jnp.maximum(h, 0.0).astype(jnp.bfloat16)                       # (32, C)

        h = jnp.dot(w3, h, preferred_element_type=jnp.float32) + b3
        h = jnp.maximum(h, 0.0).astype(jnp.bfloat16)                       # (16, C)

        out = jnp.dot(w4, h, preferred_element_type=jnp.float32) + b4      # (3, C)
        o_ref[:, pl.ds(start, _CHUNK)] = out.astype(o_ref.dtype)
        return carry

    if n_chunks == 1:
        body(0, 0)
    else:
        lax.fori_loop(0, n_chunks, body, 0, unroll=2)


def _choose_tb(batch, block_b):
    # Tile: multiple of the inner chunk size (itself a multiple of 128 lanes),
    # large enough to amortize the ~0.35 us per-grid-step overhead.
    tb = max(_CHUNK, _round_up(min(block_b, batch), _CHUNK))
    # v7x dual-TC: ensure >=2 grid steps when the batch allows it so the
    # "parallel" batch axis shards across both TensorCores (no-op on v5e/v6e).
    if batch > _CHUNK:
        tb = min(tb, _round_up(-(-batch // 2), _CHUNK))
    return tb


def ikmlp_forward_feature_major(xt, params, *, block_b=32768, out_dtype=jnp.float32):
    """Performance path.  xt: (5, B) f32 feature-major.  Returns (3, B).

    No wrapper-side HBM round trips (pad only when B % tile != 0); the bf16
    cast of the input happens inside the kernel.
    """
    (w1, b1), (w2, b2), (w3, b3), (w4, b4) = params
    nfeat, batch = xt.shape
    assert nfeat == 5

    tb = _choose_tb(batch, block_b)
    b_pad = _round_up(batch, tb)
    if b_pad != batch:
        xt = jnp.pad(xt, ((0, 0), (0, b_pad - batch)))
    xt = xt.astype(jnp.float32)

    def wb(w, b):
        return w.astype(jnp.bfloat16), b.reshape(-1, 1).astype(jnp.float32)

    w1b, b1c = wb(w1, b1)
    w2b, b2c = wb(w2, b2)
    w3b, b3c = wb(w3, b3)
    w4b, b4c = wb(w4, b4)

    # Weights/biases: constant block index -> VMEM-resident across grid steps.
    resident = lambda shape: pl.BlockSpec(shape, lambda i: (0, 0))
    # Activations: tiled along the (lane) batch axis.
    batched = lambda rows: pl.BlockSpec((rows, tb), lambda i: (0, i))

    y = pl.pallas_call(
        ikmlp_kernel,
        out_shape=jax.ShapeDtypeStruct((3, b_pad), out_dtype),
        grid=(b_pad // tb,),
        in_specs=[
            batched(5),
            resident(w1b.shape), resident(b1c.shape),
            resident(w2b.shape), resident(b2c.shape),
            resident(w3b.shape), resident(b3c.shape),
            resident(w4b.shape), resident(b4c.shape),
        ],
        out_specs=batched(3),
        # VMEM use is ~a few MB even at block_b=64K (intermediates are chunked),
        # so the default scoped-VMEM limits suffice on v5e/v6e/v7x.
        compiler_params=pltpu.CompilerParams(
            dimension_semantics=("parallel",)),
    )(xt, w1b, b1c, w2b, b2c, w3b, b3c, w4b, b4c)

    return y[:, :batch] if b_pad != batch else y


def ikmlp_forward(x, params, *, block_b=32768, out_dtype=jnp.float32):
    """PyTorch-compatible wrapper.  x: (B, 5) f32 -> (B, 3).

    Does the (B,5)<->(5,B) layout plumbing; if the surrounding model can keep
    feature-major layouts, call `ikmlp_forward_feature_major` directly to
    avoid the extra HBM copies.
    """
    yt = ikmlp_forward_feature_major(x.T, params, block_b=block_b,
                                     out_dtype=out_dtype)
    return yt.T


def init_params(key):
    """PyTorch nn.Linear-style init: W (out,in), b (out,), U(-1/sqrt(fan_in), +)."""
    sizes = [(5, 64), (64, 32), (32, 16), (16, 3)]
    params = []
    for fan_in, fan_out in sizes:
        key, kw, kb = jax.random.split(key, 3)
        bound = 1.0 / jnp.sqrt(jnp.float32(fan_in))
        w = jax.random.uniform(kw, (fan_out, fan_in), jnp.float32, -bound, bound)
        b = jax.random.uniform(kb, (fan_out,), jnp.float32, -bound, bound)
        params.append((w, b))
    return params


def reference_forward(x, params):
    h = x
    for i, (w, b) in enumerate(params):
        h = h @ w.T + b
        if i < len(params) - 1:
            h = jnp.maximum(h, 0.0)
    return h


if __name__ == "__main__":
    key = jax.random.PRNGKey(0)
    kp, kx = jax.random.split(key)

    params = init_params(kp)

    # Small primary test (single grid step, single inner chunk).
    batch = 8
    x = jax.random.normal(kx, (batch, 5), jnp.float32)
    out = jax.block_until_ready(ikmlp_forward(x, params))
    ref = reference_forward(x, params)
    assert out.shape == (batch, 3)
    assert out.dtype == jnp.float32
    assert jnp.allclose(out, ref, atol=2e-2, rtol=2e-2), float(jnp.max(jnp.abs(out - ref)))

    # Multi grid-step + multi inner-chunk + padding path.
    x2 = jax.random.normal(jax.random.PRNGKey(1), (2600, 5), jnp.float32)
    out2 = jax.block_until_ready(ikmlp_forward(x2, params))
    ref2 = reference_forward(x2, params)
    assert out2.shape == (2600, 3)
    assert jnp.allclose(out2, ref2, atol=2e-2, rtol=2e-2), float(jnp.max(jnp.abs(out2 - ref2)))

    # Feature-major fast path (no layout plumbing) agrees with the wrapper.
    out_fm = jax.block_until_ready(ikmlp_forward_feature_major(x2.T, params))
    assert out_fm.shape == (3, 2600)
    assert jnp.allclose(out_fm, out2.T, atol=1e-6, rtol=1e-6)

    print("KERNEL_OK")
</pallas_src>

<mosaic_0001>
module attributes {stable_mosaic.version = 11 : i64} {
  func.func @ikmlp_kernel(%arg0: i32, %arg1: memref<5x512xf32, #tpu.memory_space<vmem>>, %arg2: memref<64x5xbf16, #tpu.memory_space<vmem>>, %arg3: memref<64x1xf32, #tpu.memory_space<vmem>>, %arg4: memref<32x64xbf16, #tpu.memory_space<vmem>>, %arg5: memref<32x1xf32, #tpu.memory_space<vmem>>, %arg6: memref<16x32xbf16, #tpu.memory_space<vmem>>, %arg7: memref<16x1xf32, #tpu.memory_space<vmem>>, %arg8: memref<3x16xbf16, #tpu.memory_space<vmem>>, %arg9: memref<3x1xf32, #tpu.memory_space<vmem>>, %arg10: memref<3x512xf32, #tpu.memory_space<vmem>>) attributes {dimension_semantics = [#tpu.dimension_semantics<parallel>], iteration_bounds = array<i64: 1>, scalar_prefetch = 0 : i64, scratch_operands = 0 : i64, tpu.core_type = #tpu.core_type<tc>, window_params = [{transform_indices = @transform_0, window_bounds = array<i64: 5, 512>}, {pipeline_mode = #tpu.pipeline_mode<synchronous>, transform_indices = @transform_1, window_bounds = array<i64: 64, 5>}, {pipeline_mode = #tpu.pipeline_mode<synchronous>, transform_indices = @transform_2, window_bounds = array<i64: 64, 1>}, {pipeline_mode = #tpu.pipeline_mode<synchronous>, transform_indices = @transform_3, window_bounds = array<i64: 32, 64>}, {pipeline_mode = #tpu.pipeline_mode<synchronous>, transform_indices = @transform_4, window_bounds = array<i64: 32, 1>}, {pipeline_mode = #tpu.pipeline_mode<synchronous>, transform_indices = @transform_5, window_bounds = array<i64: 16, 32>}, {pipeline_mode = #tpu.pipeline_mode<synchronous>, transform_indices = @transform_6, window_bounds = array<i64: 16, 1>}, {pipeline_mode = #tpu.pipeline_mode<synchronous>, transform_indices = @transform_7, window_bounds = array<i64: 3, 16>}, {pipeline_mode = #tpu.pipeline_mode<synchronous>, transform_indices = @transform_8, window_bounds = array<i64: 3, 1>}, {transform_indices = @transform_9, window_bounds = array<i64: 3, 512>}]} {
    %c0 = arith.constant 0 : index
    %c0_0 = arith.constant 0 : index
    %0 = vector.load %arg2[%c0, %c0_0] : memref<64x5xbf16, #tpu.memory_space<vmem>>, vector<64x5xbf16>
    %c0_1 = arith.constant 0 : index
    %c0_2 = arith.constant 0 : index
    %1 = vector.load %arg4[%c0_1, %c0_2] : memref<32x64xbf16, #tpu.memory_space<vmem>>, vector<32x64xbf16>
    %c0_3 = arith.constant 0 : index
    %c0_4 = arith.constant 0 : index
    %2 = vector.load %arg6[%c0_3, %c0_4] : memref<16x32xbf16, #tpu.memory_space<vmem>>, vector<16x32xbf16>
    %c0_5 = arith.constant 0 : index
    %c0_6 = arith.constant 0 : index
    %3 = vector.load %arg8[%c0_5, %c0_6] : memref<3x16xbf16, #tpu.memory_space<vmem>>, vector<3x16xbf16>
    %c0_7 = arith.constant 0 : index
    %c0_8 = arith.constant 0 : index
    %4 = vector.load %arg3[%c0_7, %c0_8] : memref<64x1xf32, #tpu.memory_space<vmem>>, vector<64x1xf32>
    %5 = vector.shape_cast %4 : vector<64x1xf32> to vector<64x1xf32>
    %6 = vector.broadcast %5 : vector<64x1xf32> to vector<64x512xf32>
    %c0_9 = arith.constant 0 : index
    %c0_10 = arith.constant 0 : index
    %7 = vector.load %arg5[%c0_9, %c0_10] : memref<32x1xf32, #tpu.memory_space<vmem>>, vector<32x1xf32>
    %8 = vector.shape_cast %7 : vector<32x1xf32> to vector<32x1xf32>
    %9 = vector.broadcast %8 : vector<32x1xf32> to vector<32x512xf32>
    %c0_11 = arith.constant 0 : index
    %c0_12 = arith.constant 0 : index
    %10 = vector.load %arg7[%c0_11, %c0_12] : memref<16x1xf32, #tpu.memory_space<vmem>>, vector<16x1xf32>
    %11 = vector.shape_cast %10 : vector<16x1xf32> to vector<16x1xf32>
    %12 = vector.broadcast %11 : vector<16x1xf32> to vector<16x512xf32>
    %c0_13 = arith.constant 0 : index
    %c0_14 = arith.constant 0 : index
    %13 = vector.load %arg9[%c0_13, %c0_14] : memref<3x1xf32, #tpu.memory_space<vmem>>, vector<3x1xf32>
    %14 = vector.shape_cast %13 : vector<3x1xf32> to vector<3x1xf32>
    %15 = vector.broadcast %14 : vector<3x1xf32> to vector<3x512xf32>
    %c0_15 = arith.constant 0 : index
    %c0_16 = arith.constant 0 : index
    %16 = vector.load %arg1[%c0_15, %c0_16] : memref<5x512xf32, #tpu.memory_space<vmem>>, vector<5x512xf32>
    %17 = arith.truncf %16 : vector<5x512xf32> to vector<5x512xbf16>
    %cst = arith.constant dense<0.000000e+00> : vector<64x512xf32>
    %18 = tpu.matmul %0, %17, %cst {dimension_numbers = #tpu.dot_dimension_numbers<[1], [0], [0], [1], [0, 0, 1, 1], [], []>} : vector<64x5xbf16>, vector<5x512xbf16>, vector<64x512xf32> -> vector<64x512xf32>
    %19 = arith.addf %18, %6 : vector<64x512xf32>
    %cst_17 = arith.constant 0.000000e+00 : f32
    %20 = vector.broadcast %cst_17 : f32 to vector<64x512xf32>
    %21 = arith.maximumf %19, %20 : vector<64x512xf32>
    %22 = arith.truncf %21 : vector<64x512xf32> to vector<64x512xbf16>
    %cst_18 = arith.constant dense<0.000000e+00> : vector<32x512xf32>
    %23 = tpu.matmul %1, %22, %cst_18 {dimension_numbers = #tpu.dot_dimension_numbers<[1], [0], [0], [1], [0, 0, 1, 1], [], []>} : vector<32x64xbf16>, vector<64x512xbf16>, vector<32x512xf32> -> vector<32x512xf32>
    %24 = arith.addf %23, %9 : vector<32x512xf32>
    %cst_19 = arith.constant 0.000000e+00 : f32
    %25 = vector.broadcast %cst_19 : f32 to vector<32x512xf32>
    %26 = arith.maximumf %24, %25 : vector<32x512xf32>
    %27 = arith.truncf %26 : vector<32x512xf32> to vector<32x512xbf16>
    %cst_20 = arith.constant dense<0.000000e+00> : vector<16x512xf32>
    %28 = tpu.matmul %2, %27, %cst_20 {dimension_numbers = #tpu.dot_dimension_numbers<[1], [0], [0], [1], [0, 0, 1, 1], [], []>} : vector<16x32xbf16>, vector<32x512xbf16>, vector<16x512xf32> -> vector<16x512xf32>
    %29 = arith.addf %28, %12 : vector<16x512xf32>
    %cst_21 = arith.constant 0.000000e+00 : f32
    %30 = vector.broadcast %cst_21 : f32 to vector<16x512xf32>
    %31 = arith.maximumf %29, %30 : vector<16x512xf32>
    %32 = arith.truncf %31 : vector<16x512xf32> to vector<16x512xbf16>
    %cst_22 = arith.constant dense<0.000000e+00> : vector<3x512xf32>
    %33 = tpu.matmul %3, %32, %cst_22 {dimension_numbers = #tpu.dot_dimension_numbers<[1], [0], [0], [1], [0, 0, 1, 1], [], []>} : vector<3x16xbf16>, vector<16x512xbf16>, vector<3x512xf32> -> vector<3x512xf32>
    %34 = arith.addf %33, %15 : vector<3x512xf32>
    %c0_23 = arith.constant 0 : index
    %c0_24 = arith.constant 0 : index
    %35 = vector.load %arg10[%c0_23, %c0_24] : memref<3x512xf32, #tpu.memory_space<vmem>>, vector<3x512xf32>
    tpu.vector_store %arg10[%c0_23, %c0_24], %34 {strides = array<i32>} : memref<3x512xf32, #tpu.memory_space<vmem>>, vector<3x512xf32>,
    return
  }
  func.func @transform_0(%arg0: i32) -> (i32, i32) {
    %c0_i32 = arith.constant 0 : i32
    %c0_i32_0 = arith.constant 0 : i32
    return %c0_i32, %arg0 : i32, i32
  }
  func.func @transform_1(%arg0: i32) -> (i32, i32) {
    %c0_i32 = arith.constant 0 : i32
    %c0_i32_0 = arith.constant 0 : i32
    %c0_i32_1 = arith.constant 0 : i32
    return %c0_i32, %c0_i32_0 : i32, i32
  }
  func.func @transform_2(%arg0: i32) -> (i32, i32) {
    %c0_i32 = arith.constant 0 : i32
    %c0_i32_0 = arith.constant 0 : i32
    %c0_i32_1 = arith.constant 0 : i32
    return %c0_i32, %c0_i32_0 : i32, i32
  }
  func.func @transform_3(%arg0: i32) -> (i32, i32) {
    %c0_i32 = arith.constant 0 : i32
    %c0_i32_0 = arith.constant 0 : i32
    %c0_i32_1 = arith.constant 0 : i32
    return %c0_i32, %c0_i32_0 : i32, i32
  }
  func.func @transform_4(%arg0: i32) -> (i32, i32) {
    %c0_i32 = arith.constant 0 : i32
    %c0_i32_0 = arith.constant 0 : i32
    %c0_i32_1 = arith.constant 0 : i32
    return %c0_i32, %c0_i32_0 : i32, i32
  }
  func.func @transform_5(%arg0: i32) -> (i32, i32) {
    %c0_i32 = arith.constant 0 : i32
    %c0_i32_0 = arith.constant 0 : i32
    %c0_i32_1 = arith.constant 0 : i32
    return %c0_i32, %c0_i32_0 : i32, i32
  }
  func.func @transform_6(%arg0: i32) -> (i32, i32) {
    %c0_i32 = arith.constant 0 : i32
    %c0_i32_0 = arith.constant 0 : i32
    %c0_i32_1 = arith.constant 0 : i32
    return %c0_i32, %c0_i32_0 : i32, i32
  }
  func.func @transform_7(%arg0: i32) -> (i32, i32) {
    %c0_i32 = arith.constant 0 : i32
    %c0_i32_0 = arith.constant 0 : i32
    %c0_i32_1 = arith.constant 0 : i32
    return %c0_i32, %c0_i32_0 : i32, i32
  }
  func.func @transform_8(%arg0: i32) -> (i32, i32) {
    %c0_i32 = arith.constant 0 : i32
    %c0_i32_0 = arith.constant 0 : i32
    %c0_i32_1 = arith.constant 0 : i32
    return %c0_i32, %c0_i32_0 : i32, i32
  }
  func.func @transform_9(%arg0: i32) -> (i32, i32) {
    %c0_i32 = arith.constant 0 : i32
    %c0_i32_0 = arith.constant 0 : i32
    return %c0_i32, %arg0 : i32, i32
  }
}

</mosaic_0001>

<bundles_post_ra>
// kernel: tpu_custom_call.1
= control target key start
LH: loop header
LB: loop body
LE: loop exit
PB: predicated region body
PF: predicated region fallthrough
CT: control target
= control target key end

     0   :  { %vm180_vm0 = vcmask 1041408   ;;  %vm181_vm1 = vcmask 1042432   ;;  %v813_v2 = vmov 65535   ;;  %v814_v6 = vmov 0   ;;  %s985_s0 = inlined_call_operand.vmem [shape: f32[5,512], index: 0, kind: input, shape index: {}]   ;;  %s986_s1 = inlined_call_operand.vmem [shape: bf16[64,5], index: 1, kind: input, shape index: {}]   ;;  %s987_s2 = inlined_call_operand.vmem [shape: f32[64,1], index: 2, kind: input, shape index: {}]   ;;  %s988_s3 = inlined_call_operand.vmem [shape: bf16[32,64], index: 3, kind: input, shape index: {}]   ;;  %s989_s4 = inlined_call_operand.vmem [shape: f32[32,1], index: 4, kind: input, shape index: {}]   ;;  %s990_s5 = inlined_call_operand.vmem [shape: bf16[16,32], index: 5, kind: input, shape index: {}]   ;;  %s991_s6 = inlined_call_operand.vmem [shape: f32[16,1], index: 6, kind: input, shape index: {}]   ;;  %s992_s7 = inlined_call_operand.vmem [shape: bf16[3,16], index: 7, kind: input, shape index: {}]   ;;  %s993_s8 = inlined_call_operand.vmem [shape: f32[3,1], index: 8, kind: input, shape index: {}]   ;;  %s994_s9 = inlined_call_operand.hbm [shape: f32[3,512], index: 9, kind: output, shape index: {}]  }
   0x1   :  { %v140_v0 = vld [vmem:[%s985_s0 + $0x8] sm:$0x1f]  ;;  %v182_v3 = vsel %vm180_vm0, 4294967295, %v813_v2  ;;  %v142_v4 = vld [vmem:[%s985_s0 + $0x18] sm:$0x1f]  ;;  %228 = vmatprep.mubr.bf16.mxu0 %v814_v6  ;;  %301 = vmatprep.mubr.bf16.mxu1 %v814_v6  ;;  %v782_v16 = vld [vmem:[%s986_s1] sm:$0xff]  }
   0x2   :  { %v144_v1 = vpack.c.bf16 %v140_v0, %v140_v0  ;;  %v139_v5 = vld [vmem:[%s985_s0] sm:$0x1f]  ;;  %v183_v7 = vsel %vm181_vm1, %v182_v3, 0  ;;  %v146_v8 = vpack.c.bf16 %v142_v4, %v142_v4  ;;  %v141_v10 = vld [vmem:[%s985_s0 + $0x10] sm:$0x1f]  ;;  %780 = vset.pattern.permute.xlu0 %v814_v6  ;;  %781 = vset.pattern.permute.xlu1 %v814_v6  ;;  %vm167_vm2 = vcmask 39936  }
   0x3   :  { %v143_v9 = vpack.c.bf16 %v139_v5, %v139_v5  ;;  %v145_v12 = vpack.c.bf16 %v141_v10, %v141_v10  ;;  %v49_v17 = vld [vmem:[%s987_s2] sm:$0xff]  ;;  %v51_v18 = vld [vmem:[%s987_s2 + $0x10] sm:$0xff]  ;;  %v50_v19 = vld [vmem:[%s987_s2 + $0x8] sm:$0xff] }
   0x4   :  { %v188_v11 = vand.u32 %v183_v7, %v144_v1  ;;  %v194_v13 = vand.u32 %v183_v7, %v146_v8  ;;  %59 = vperm.xlu0 %780, %v49_v17   ;;  %69 = vperm.xlu1 %781, %v51_v18   ;;  %v52_v20 = vld [vmem:[%s987_s2 + $0x18] sm:$0xff]  ;;  %v783_v21 = vld [vmem:[%s986_s1 + $0x8] sm:$0xff]   ;;  %v53_v22 = vld [vmem:[%s987_s2 + $0x20] sm:$0xff] }
   0x5   :  { %v185_v14 = vand.u32 %v183_v7, %v143_v9  ;;  %v191_v15 = vand.u32 %v183_v7, %v145_v12  ;;  %v54_v23 = vld [vmem:[%s987_s2 + $0x28] sm:$0xff] }
   0x6   :  { %196 = vmatprep.subr.bf16.mxu0 %v188_v11  ;;  %269 = vmatprep.subr.bf16.mxu1 %v194_v13 }
   0x7   :  { %197 = vmatpush1.bf16.msra.mxu0 %v185_v14  ;;  %270 = vmatpush1.bf16.msra.mxu1 %v191_v15 }
   0x8   :  { %64 = vperm.xlu0 %780, %v50_v19   ;;  %74 = vperm.xlu1 %781, %v52_v20  }
   0xa   :  { %758 = vmatmul.mubr.msk.bf16.vlgmr.msra.gmra.mrb[0].mxu0 %vm167_vm2, %v782_v16  ;;  %762 = vmatmul.mubr.msk.bf16.vlgmr.msra.gmra.mrb[0].mxu1 %vm167_vm2, %v782_v16 }
   0xb   :  { %238 = vmatprep.mubr.bf16.mxu0 %v814_v6  ;;  %311 = vmatprep.mubr.bf16.mxu1 %v814_v6 }
   0xc   :  { %14 = vsyncpa [#allocation3], 0  ;;  %79 = vperm.xlu0 %780, %v53_v22   ;;  %v55_v24 = vld [vmem:[%s987_s2 + $0x30] sm:$0xff]  ;;  %84 = vperm.xlu1 %781, %v54_v23   ;;  %v56_v25 = vld [vmem:[%s987_s2 + $0x38] sm:$0xff]  ;;  %vm400_vm3 = vcmask 523264   ;;  %vm542_vm4 = vcmask 261120  }
   0xd   :  { %v97_v26 = vld [vmem:[%s989_s4] sm:$0xff]  ;;  %v784_v27 = vld [vmem:[%s986_s1 + $0x10] sm:$0xff]   ;;  %v98_v28 = vld [vmem:[%s989_s4 + $0x8] sm:$0xff]  ;;  %vm644_vm5 = vcmask 130048   ;;  %s815_s12 = smov [#allocation2]  }
   0xe   :  { %v99_v29 = vld [vmem:[%s989_s4 + $0x10] sm:$0xff]  ;;  %v100_v30 = vld [vmem:[%s989_s4 + $0x18] sm:$0xff]  ;;  %v121_v31 = vld [vmem:[%s991_s6] sm:$0xff]  ;;  %s746_s13 = sshll.u32 %s815_s12, 4  ;;  %s747_s13 = int_to_ptr.vmem [resolvable:$true] %s746_s13 }
   0xf   :  { %v785_v32 = vld [vmem:[%s986_s1 + $0x18] sm:$0xff]   ;;  %v122_v33 = vld [vmem:[%s991_s6 + $0x8] sm:$0xff]  ;;  %v133_v34 = vld [vmem:[%s993_s8] sm:$0x7]  ;;  %p794_p1 = scmp.lt.s32.totalorder %s747_s13, %s747_s13 }
  0x10   :  { %89 = vperm.xlu0 %780, %v55_v24   ;;  %94 = vperm.xlu1 %781, %v56_v25  }
  0x12   :  { %759 = vmatmul.mubr.msk.bf16.gmra.mrb[4].mxu0 %vm167_vm2, %v783_v21  ;;  %763 = vmatmul.mubr.msk.bf16.gmra.mrb[4].mxu1 %vm167_vm2, %v783_v21 }
  0x13   :  { %248 = vmatprep.mubr.bf16.mxu0 %v814_v6  ;;  %321 = vmatprep.mubr.bf16.mxu1 %v814_v6 }
  0x14   :  { %103 = vperm.xlu0 %780, %v97_v26   ;;  %108 = vperm.xlu1 %781, %v98_v28  }
  0x18   :  { %113 = vperm.xlu0 %780, %v99_v29   ;;  %118 = vperm.xlu1 %781, %v100_v30  }
  0x1a   :  { %760 = vmatmul.mubr.msk.bf16.gmra.mrb[8].mxu0 %vm167_vm2, %v784_v27  ;;  %764 = vmatmul.mubr.msk.bf16.gmra.mrb[8].mxu1 %vm167_vm2, %v784_v27 }
  0x1b   :  { %258 = vmatprep.mubr.bf16.mxu0 %v814_v6  ;;  %331 = vmatprep.mubr.bf16.mxu1 %v814_v6 }
  0x1c   :  { %125 = vperm.xlu0 %780, %v121_v31   ;;  %130 = vperm.xlu1 %781, %v122_v33  }
  0x20   :  { %136 = vperm.xlu0 %780, %v133_v34  }
  0x22   :  { %761 = vmatmul.mubr.msk.bf16.gmra.mrb[12].mxu0 %vm167_vm2, %v785_v32  ;;  %765 = vmatmul.mubr.msk.bf16.gmra.mrb[12].mxu1 %vm167_vm2, %v785_v32 }
  0x23   :  { %439 = vmatprep.mubr.bf16.mxu0 %v814_v6  ;;  %492 = vmatprep.mubr.bf16.mxu1 %v814_v6 }
  0x83   :  { %v60_v35 = vpop.permute.xlu0 %59  ;;  %v70_v36 = vpop.permute.xlu1 %69 }
  0x87   :  { %v65_v37 = vpop.permute.xlu0 %64  ;;  %v75_v63 = vpop.permute.xlu1 %74 }
  0x8b   :  { %v80_v26 = vpop.permute.xlu0 %79  ;;  %v85_v30 = vpop.permute.xlu1 %84 }
  0xdd   :  { %v230_v38 = vpop.f32.mrb[0].mxu0  ;;  %v303_v40 = vpop.f32.mrb[0].mxu1 }
  0xde   :  { %v231_v39 = vadd.f32 %v230_v38, %v60_v35  ;;  %v232_v41 = vpop.f32.mrb[1].mxu0  ;;  %v304_v42 = vadd.f32 %v303_v40, %v60_v35  ;;  %v305_v44 = vpop.f32.mrb[1].mxu1 }
  0xdf   :  { %v233_v43 = vadd.f32 %v232_v41, %v60_v35  ;;  %v234_v45 = vpop.f32.mrb[2].mxu0  ;;  %v306_v46 = vadd.f32 %v305_v44, %v60_v35  ;;  %v307_v48 = vpop.f32.mrb[2].mxu1 }
  0xe0   :  { %v235_v47 = vadd.f32 %v234_v45, %v65_v37  ;;  %v236_v49 = vpop.f32.mrb[3].mxu0  ;;  %v308_v50 = vadd.f32 %v307_v48, %v65_v37  ;;  %v309_v52 = vpop.f32.mrb[3].mxu1  ;;  %v342_v53 = vmax.f32 %v231_v39, 0.0  ;;  %v344_v56 = vmax.f32 %v304_v42, 0.0 }
  0xe1   :  { %v237_v51 = vadd.f32 %v236_v49, %v65_v37  ;;  %v310_v55 = vadd.f32 %v309_v52, %v65_v37  ;;  %v343_v57 = vmax.f32 %v233_v43, 0.0  ;;  %v345_v60 = vmax.f32 %v306_v46, 0.0 }
  0xe2   :  { %v346_v54 = vmax.f32 %v235_v47, 0.0  ;;  %v348_v58 = vmax.f32 %v308_v50, 0.0 }
  0xe3   :  { %v347_v59 = vmax.f32 %v237_v51, 0.0  ;;  %v349_v62 = vmax.f32 %v310_v55, 0.0 }
  0xe4   :  { %v374_v61 = vpack.c.bf16 %v346_v54, %v342_v53  ;;  %v376_v0 = vpack.c.bf16 %v348_v58, %v344_v56  ;;  %v90_v56 = vpop.permute.xlu0 %89 }
  0xe5   :  { %v375_v1 = vpack.c.bf16 %v347_v59, %v343_v57  ;;  %v240_v2 = vpop.f32.mrb[4].mxu0  ;;  %v377_v3 = vpack.c.bf16 %v349_v62, %v345_v60  ;;  %v313_v5 = vpop.f32.mrb[4].mxu1 }
  0xe6   :  { %v241_v4 = vadd.f32 %v240_v2, %v70_v36  ;;  %v242_v7 = vpop.f32.mrb[5].mxu0  ;;  %v314_v8 = vadd.f32 %v313_v5, %v70_v36  ;;  %v315_v10 = vpop.f32.mrb[5].mxu1 }
  0xe7   :  { %v243_v9 = vadd.f32 %v242_v7, %v70_v36  ;;  %v244_v11 = vpop.f32.mrb[6].mxu0  ;;  %407 = vmatprep.subr.bf16.mxu0 %v375_v1  ;;  %v316_v12 = vadd.f32 %v315_v10, %v70_v36  ;;  %v317_v14 = vpop.f32.mrb[6].mxu1  ;;  %460 = vmatprep.subr.bf16.mxu1 %v377_v3 }
  0xe8   :  { %v245_v13 = vadd.f32 %v244_v11, %v75_v63  ;;  %v246_v15 = vpop.f32.mrb[7].mxu0  ;;  %408 = vmatpush1.bf16.msra.mxu0 %v374_v61  ;;  %v318_v16 = vadd.f32 %v317_v14, %v75_v63  ;;  %v319_v18 = vpop.f32.mrb[7].mxu1  ;;  %461 = vmatpush1.bf16.msra.mxu1 %v376_v0  ;;  %v350_v19 = vmax.f32 %v241_v4, 0.0  ;;  %v352_v22 = vmax.f32 %v314_v8, 0.0 }
  0xe9   :  { %v247_v17 = vadd.f32 %v246_v15, %v75_v63  ;;  %v320_v21 = vadd.f32 %v319_v18, %v75_v63  ;;  %v351_v23 = vmax.f32 %v243_v9, 0.0  ;;  %v353_v27 = vmax.f32 %v316_v12, 0.0  ;;  %v95_v60 = vpop.permute.xlu1 %94 }
  0xea   :  { %v354_v20 = vmax.f32 %v245_v13, 0.0  ;;  %v356_v24 = vmax.f32 %v318_v16, 0.0 }
  0xeb   :  { %v355_v25 = vmax.f32 %v247_v17, 0.0  ;;  %v357_v29 = vmax.f32 %v320_v21, 0.0 }
  0xec   :  { %v378_v28 = vpack.c.bf16 %v354_v20, %v350_v19  ;;  %v380_v31 = vpack.c.bf16 %v356_v24, %v352_v22 }
  0xed   :  { %v379_v32 = vpack.c.bf16 %v355_v25, %v351_v23  ;;  %v250_v33 = vpop.f32.mrb[8].mxu0  ;;  %v381_v34 = vpack.c.bf16 %v357_v29, %v353_v27  ;;  %v323_v36 = vpop.f32.mrb[8].mxu1  ;;  %v786_v29 = vld [vmem:[%s988_s3] sm:$0xff]  }
  0xee   :  { %v251_v35 = vadd.f32 %v250_v33, %v80_v26  ;;  %v252_v37 = vpop.f32.mrb[9].mxu0  ;;  %v324_v38 = vadd.f32 %v323_v36, %v80_v26  ;;  %v325_v40 = vpop.f32.mrb[9].mxu1 }
  0xef   :  { %v253_v39 = vadd.f32 %v252_v37, %v80_v26  ;;  %v254_v41 = vpop.f32.mrb[10].mxu0  ;;  %409 = vmatprep.subr.bf16.mxu0 %v379_v32  ;;  %v326_v42 = vadd.f32 %v325_v40, %v80_v26  ;;  %v327_v44 = vpop.f32.mrb[10].mxu1  ;;  %462 = vmatprep.subr.bf16.mxu1 %v381_v34 }
  0xf0   :  { %v255_v43 = vadd.f32 %v254_v41, %v85_v30  ;;  %v256_v45 = vpop.f32.mrb[11].mxu0  ;;  %410 = vmatpush1.bf16.msra.mxu0 %v378_v28  ;;  %v328_v46 = vadd.f32 %v327_v44, %v85_v30  ;;  %v329_v48 = vpop.f32.mrb[11].mxu1  ;;  %463 = vmatpush1.bf16.msra.mxu1 %v380_v31  ;;  %v358_v49 = vmax.f32 %v251_v35, 0.0  ;;  %v360_v52 = vmax.f32 %v324_v38, 0.0 }
  0xf1   :  { %v257_v47 = vadd.f32 %v256_v45, %v85_v30  ;;  %v330_v51 = vadd.f32 %v329_v48, %v85_v30  ;;  %v359_v53 = vmax.f32 %v253_v39, 0.0  ;;  %v361_v57 = vmax.f32 %v326_v42, 0.0  ;;  %v787_v30 = vld [vmem:[%s988_s3 + $0x8] sm:$0xff]   ;;  %v104_v31 = vpop.permute.xlu0 %103  ;;  %v109_v32 = vpop.permute.xlu1 %108 }
  0xf2   :  { %v362_v50 = vmax.f32 %v255_v43, 0.0  ;;  %v364_v54 = vmax.f32 %v328_v46, 0.0 }
  0xf3   :  { %v363_v55 = vmax.f32 %v257_v47, 0.0  ;;  %v365_v59 = vmax.f32 %v330_v51, 0.0 }
  0xf4   :  { %v382_v58 = vpack.c.bf16 %v362_v50, %v358_v49  ;;  %v384_v61 = vpack.c.bf16 %v364_v54, %v360_v52 }
  0xf5   :  { %v383_v62 = vpack.c.bf16 %v363_v55, %v359_v53  ;;  %v260_v63 = vpop.f32.mrb[12].mxu0  ;;  %v385_v0 = vpack.c.bf16 %v365_v59, %v361_v57  ;;  %v333_v2 = vpop.f32.mrb[12].mxu1 }
  0xf6   :  { %v261_v1 = vadd.f32 %v260_v63, %v90_v56  ;;  %v262_v3 = vpop.f32.mrb[13].mxu0  ;;  %v334_v4 = vadd.f32 %v333_v2, %v90_v56  ;;  %v335_v7 = vpop.f32.mrb[13].mxu1 }
  0xf7   :  { %v263_v5 = vadd.f32 %v262_v3, %v90_v56  ;;  %v264_v8 = vpop.f32.mrb[14].mxu0  ;;  %411 = vmatprep.subr.bf16.mxu0 %v383_v62  ;;  %v336_v9 = vadd.f32 %v335_v7, %v90_v56  ;;  %v337_v11 = vpop.f32.mrb[14].mxu1  ;;  %464 = vmatprep.subr.bf16.mxu1 %v385_v0 }
  0xf8   :  { %v265_v10 = vadd.f32 %v264_v8, %v95_v60  ;;  %v266_v12 = vpop.f32.mrb[15].mxu0  ;;  %412 = vmatpush1.bf16.msra.mxu0 %v382_v58  ;;  %v338_v13 = vadd.f32 %v337_v11, %v95_v60  ;;  %v339_v15 = vpop.f32.mrb[15].mxu1  ;;  %465 = vmatpush1.bf16.msra.mxu1 %v384_v61  ;;  %v366_v16 = vmax.f32 %v261_v1, 0.0  ;;  %v368_v19 = vmax.f32 %v334_v4, 0.0 }
  0xf9   :  { %v267_v14 = vadd.f32 %v266_v12, %v95_v60  ;;  %v340_v18 = vadd.f32 %v339_v15, %v95_v60  ;;  %v367_v20 = vmax.f32 %v263_v5, 0.0  ;;  %v369_v23 = vmax.f32 %v336_v9, 0.0  ;;  %v114_v55 = vpop.permute.xlu0 %113  ;;  %v119_v59 = vpop.permute.xlu1 %118 }
  0xfa   :  { %v370_v17 = vmax.f32 %v265_v10, 0.0  ;;  %v372_v21 = vmax.f32 %v338_v13, 0.0 }
  0xfb   :  { %v371_v22 = vmax.f32 %v267_v14, 0.0  ;;  %v373_v25 = vmax.f32 %v340_v18, 0.0 }
  0xfc   :  { %v386_v24 = vpack.c.bf16 %v370_v17, %v366_v16  ;;  %v388_v26 = vpack.c.bf16 %v372_v21, %v368_v19 }
  0xfd   :  { %v387_v27 = vpack.c.bf16 %v371_v22, %v367_v20  ;;  %v389_v28 = vpack.c.bf16 %v373_v25, %v369_v23 }
  0xff   :  { %413 = vmatprep.subr.bf16.mxu0 %v387_v27  ;;  %466 = vmatprep.subr.bf16.mxu1 %v389_v28  ;;  %v788_v28 = vld [vmem:[%s990_s5] sm:$0xff]  }
 0x100   :  { %414 = vmatpush1.bf16.msra.mxu0 %v386_v24  ;;  %467 = vmatpush1.bf16.msra.mxu1 %v388_v26 }
 0x103   :  { %768 = vmatmul.mubr.msk.bf16.vlgmr.msra.gmra.mrb[16].mxu0 %vm400_vm3, %v786_v29  ;;  %770 = vmatmul.mubr.msk.bf16.vlgmr.msra.gmra.mrb[16].mxu1 %vm400_vm3, %v786_v29  ;;  %v126_v29 = vpop.permute.xlu0 %125 }
 0x104   :  { %449 = vmatprep.mubr.bf16.mxu0 %v814_v6  ;;  %502 = vmatprep.mubr.bf16.mxu1 %v814_v6 }
 0x10b   :  { %769 = vmatmul.mubr.msk.bf16.gmra.mrb[20].mxu0 %vm400_vm3, %v787_v30  ;;  %771 = vmatmul.mubr.msk.bf16.gmra.mrb[20].mxu1 %vm400_vm3, %v787_v30  ;;  %v131_v30 = vpop.permute.xlu1 %130 }
 0x10c   :  { %578 = vmatprep.mubr.bf16.mxu0 %v814_v6  ;;  %621 = vmatprep.mubr.bf16.mxu1 %v814_v6 }
 0x1d6   :  { %v441_v33 = vpop.f32.mrb[16].mxu0  ;;  %v494_v35 = vpop.f32.mrb[16].mxu1 }
 0x1d7   :  { %v442_v34 = vadd.f32 %v441_v33, %v104_v31  ;;  %v443_v36 = vpop.f32.mrb[17].mxu0  ;;  %v495_v37 = vadd.f32 %v494_v35, %v104_v31  ;;  %v496_v39 = vpop.f32.mrb[17].mxu1 }
 0x1d8   :  { %v444_v38 = vadd.f32 %v443_v36, %v104_v31  ;;  %v445_v40 = vpop.f32.mrb[18].mxu0  ;;  %v497_v41 = vadd.f32 %v496_v39, %v104_v31  ;;  %v498_v43 = vpop.f32.mrb[18].mxu1 }
 0x1d9   :  { %v446_v42 = vadd.f32 %v445_v40, %v109_v32  ;;  %v447_v44 = vpop.f32.mrb[19].mxu0  ;;  %v499_v45 = vadd.f32 %v498_v43, %v109_v32  ;;  %v500_v47 = vpop.f32.mrb[19].mxu1  ;;  %v513_v48 = vmax.f32 %v442_v34, 0.0  ;;  %v515_v51 = vmax.f32 %v495_v37, 0.0 }
 0x1da   :  { %v448_v46 = vadd.f32 %v447_v44, %v109_v32  ;;  %v501_v50 = vadd.f32 %v500_v47, %v109_v32  ;;  %v514_v52 = vmax.f32 %v444_v38, 0.0  ;;  %v516_v56 = vmax.f32 %v497_v41, 0.0 }
 0x1db   :  { %v517_v49 = vmax.f32 %v446_v42, 0.0  ;;  %v519_v53 = vmax.f32 %v499_v45, 0.0 }
 0x1dc   :  { %v518_v54 = vmax.f32 %v448_v46, 0.0  ;;  %v520_v58 = vmax.f32 %v501_v50, 0.0 }
 0x1dd   :  { %v529_v57 = vpack.c.bf16 %v517_v49, %v513_v48  ;;  %v531_v60 = vpack.c.bf16 %v519_v53, %v515_v51 }
 0x1de   :  { %v530_v61 = vpack.c.bf16 %v518_v54, %v514_v52  ;;  %v451_v62 = vpop.f32.mrb[20].mxu0  ;;  %v532_v63 = vpack.c.bf16 %v520_v58, %v516_v56  ;;  %v504_v1 = vpop.f32.mrb[20].mxu1  ;;  %v48_v58 = vld [vmem:[%s992_s7] sm:$0x3]  ;;  %s789_s7 = scalar_lea.vmem %s747_s13, 256 }
 0x1df   :  { %v452_v0 = vadd.f32 %v451_v62, %v114_v55  ;;  %v453_v2 = vpop.f32.mrb[21].mxu0  ;;  %v505_v3 = vadd.f32 %v504_v1, %v114_v55  ;;  %v506_v5 = vpop.f32.mrb[21].mxu1  ;;  %p790_p0 = scmp.ne.s32.totalorder %s747_s13, %s789_s7  ;;  %p795_p2 = scmp.lt.s32.totalorder %s789_s7, %s789_s7 }
 0x1e0   :  { %v454_v4 = vadd.f32 %v453_v2, %v114_v55  ;;  %v455_v7 = vpop.f32.mrb[22].mxu0  ;;  %546 = vmatprep.subr.bf16.mxu0 %v530_v61  ;;  %v507_v8 = vadd.f32 %v506_v5, %v114_v55  ;;  %v508_v10 = vpop.f32.mrb[22].mxu1  ;;  %589 = vmatprep.subr.bf16.mxu1 %v532_v63 }
 0x1e1   :  { %v456_v9 = vadd.f32 %v455_v7, %v119_v59  ;;  %v457_v11 = vpop.f32.mrb[23].mxu0  ;;  %547 = vmatpush1.bf16.msra.mxu0 %v529_v57  ;;  %v509_v12 = vadd.f32 %v508_v10, %v119_v59  ;;  %v510_v14 = vpop.f32.mrb[23].mxu1  ;;  %590 = vmatpush1.bf16.msra.mxu1 %v531_v60  ;;  %v521_v15 = vmax.f32 %v452_v0, 0.0  ;;  %v523_v18 = vmax.f32 %v505_v3, 0.0  ;;  %p796_p3 = por %p795_p2, %p794_p1 }
 0x1e2   :  { %v458_v13 = vadd.f32 %v457_v11, %v119_v59  ;;  %v511_v17 = vadd.f32 %v510_v14, %v119_v59  ;;  %v522_v19 = vmax.f32 %v454_v4, 0.0  ;;  %v524_v22 = vmax.f32 %v507_v8, 0.0  ;;  %v137_v59 = vpop.permute.xlu0 %136 }
 0x1e3   :  { %v525_v16 = vmax.f32 %v456_v9, 0.0  ;;  %v527_v20 = vmax.f32 %v509_v12, 0.0  ;;  %p797_p4 = pnand %p796_p3, %p790_p0 }
 0x1e4   :  { %v526_v21 = vmax.f32 %v458_v13, 0.0  ;;  %v528_v24 = vmax.f32 %v511_v17, 0.0 }
 0x1e5   :  { %v533_v23 = vpack.c.bf16 %v525_v16, %v521_v15  ;;  %v535_v25 = vpack.c.bf16 %v527_v20, %v523_v18 }
 0x1e6   :  { %v534_v26 = vpack.c.bf16 %v526_v21, %v522_v19  ;;  %v536_v27 = vpack.c.bf16 %v528_v24, %v524_v22 }
 0x1e8   :  { %548 = vmatprep.subr.bf16.mxu0 %v534_v26  ;;  %591 = vmatprep.subr.bf16.mxu1 %v536_v27 }
 0x1e9   :  { %549 = vmatpush1.bf16.msra.mxu0 %v533_v23  ;;  %592 = vmatpush1.bf16.msra.mxu1 %v535_v25 }
 0x1ec   :  { %773 = vmatmul.mubr.msk.bf16.vlgmr.msra.gmra.mrb[24].mxu0 %vm542_vm4, %v788_v28  ;;  %774 = vmatmul.mubr.msk.bf16.vlgmr.msra.gmra.mrb[24].mxu1 %vm542_vm4, %v788_v28 }
 0x1ed   :  { %680 = vmatprep.mubr.bf16.mxu0 %v814_v6  ;;  %721 = vmatprep.mubr.bf16.mxu1 %v814_v6 }
 0x2bf   :  { %v580_v31 = vpop.f32.mrb[24].mxu0  ;;  %v623_v33 = vpop.f32.mrb[24].mxu1 }
 0x2c0   :  { %v581_v32 = vadd.f32 %v580_v31, %v126_v29  ;;  %v582_v34 = vpop.f32.mrb[25].mxu0  ;;  %v624_v35 = vadd.f32 %v623_v33, %v126_v29  ;;  %v625_v37 = vpop.f32.mrb[25].mxu1 }
 0x2c1   :  { %v583_v36 = vadd.f32 %v582_v34, %v126_v29  ;;  %v584_v38 = vpop.f32.mrb[26].mxu0  ;;  %v626_v39 = vadd.f32 %v625_v37, %v126_v29  ;;  %v627_v41 = vpop.f32.mrb[26].mxu1 }
 0x2c2   :  { %v585_v40 = vadd.f32 %v584_v38, %v131_v30  ;;  %v586_v42 = vpop.f32.mrb[27].mxu0  ;;  %v628_v43 = vadd.f32 %v627_v41, %v131_v30  ;;  %v629_v45 = vpop.f32.mrb[27].mxu1  ;;  %v632_v46 = vmax.f32 %v581_v32, 0.0  ;;  %v634_v48 = vmax.f32 %v624_v35, 0.0 }
 0x2c3   :  { %v587_v44 = vadd.f32 %v586_v42, %v131_v30  ;;  %v630_v6 = vadd.f32 %v629_v45, %v131_v30  ;;  %v633_v49 = vmax.f32 %v583_v36, 0.0  ;;  %v635_v52 = vmax.f32 %v626_v39, 0.0 }
 0x2c4   :  { %v636_v47 = vmax.f32 %v585_v40, 0.0  ;;  %v638_v50 = vmax.f32 %v628_v43, 0.0 }
 0x2c5   :  { %v637_v51 = vmax.f32 %v587_v44, 0.0  ;;  %v639_v54 = vmax.f32 %v630_v6, 0.0 }
 0x2c6   :  { %v640_v53 = vpack.c.bf16 %v636_v47, %v632_v46  ;;  %v642_v55 = vpack.c.bf16 %v638_v50, %v634_v48 }
 0x2c7   :  { %v641_v56 = vpack.c.bf16 %v637_v51, %v633_v49  ;;  %v643_v57 = vpack.c.bf16 %v639_v54, %v635_v52 }
 0x2c9   :  { %648 = vmatprep.subr.bf16.mxu0 %v641_v56  ;;  %689 = vmatprep.subr.bf16.mxu1 %v643_v57 }
 0x2ca   :  { %649 = vmatpush1.bf16.msra.mxu0 %v640_v53  ;;  %690 = vmatpush1.bf16.msra.mxu1 %v642_v55 }
 0x2cd   :  { %775 = vmatmul.mubr.msk.bf16.vlgmr.msra.gmra.mrb[28].mxu0 %vm644_vm5, %v48_v58  ;;  %776 = vmatmul.mubr.msk.bf16.vlgmr.msra.gmra.mrb[28].mxu1 %vm644_vm5, %v48_v58 }
 0x3a0   :  { %v682_v60 = vpop.f32.mrb[28].mxu0  ;;  %v723_v62 = vpop.f32.mrb[28].mxu1 }
 0x3a1   :  { %v683_v61 = vadd.f32 %v682_v60, %v137_v59  ;;  %v684_v63 = vpop.f32.mrb[29].mxu0  ;;  %v724_v0 = vadd.f32 %v723_v62, %v137_v59  ;;  %v725_v2 = vpop.f32.mrb[29].mxu1 }
 0x3a2   :  { %v685_v1 = vadd.f32 %v684_v63, %v137_v59  ;;  %v686_v3 = vpop.f32.mrb[30].mxu0  ;;  %v726_v4 = vadd.f32 %v725_v2, %v137_v59  ;;  %v727_v5 = vpop.f32.mrb[30].mxu1 }
 0x3a3   :  { %v687_v7 = vpop.f32.mrb[31].mxu0  ;;  %v728_v9 = vpop.f32.mrb[31].mxu1 }
 0x3a4   :  { %v734_v8 = vcombine.low %v683_v61, %v685_v1  ;;  %v735_v10 = vcombine.low %v724_v0, %v726_v4 }
 0x3a6   :  { %738 = vst [vmem:[#allocation2] sm:$0x77] %v734_v8  ;;  %739 = vst [vmem:[#allocation2 + $0x8] sm:$0x77] %v735_v10 }
 0x3a7   :  { %800 = shalt.err (!%p797_p4)
}
 0x3a8   :  { %s801_s16 = scalar_lea.hbm %s994_s9, 256 }
 0x3a9   :  { %p802_p5 = scmp.ne.s32.totalorder %s994_s9, %s801_s16  ;;  %p805_p6 = scmp.lt.u32.totalorder %s801_s16, %s994_s9 }
 0x3ab   :  { %p807_p7 = pnand %p805_p6, %p802_p5 }
 0x3ad   :  { %810 = shalt.err (!%p807_p7)
}
 0x3ae   :  { %749 = dma.vmem_to_hbm [thread:$0]  %s747_s13, 256, %s994_s9, [#allocation3]  }
 0x3af   :  { %811 = dma.done.wait [#allocation3], 256  }
 0x3b0   :  { %812 = vsyncadd [#allocation3], 4294967040 }
 0x3b1   :  { %753 = vsyncpa [#allocation3], 1 }

</bundles_post_ra>
